<compile_context>
chip_gen: v5e
topology: v5e:2x2
jax: 0.10.0
libtpu: 0.0.40
codegen_flags: <defaults>
</compile_context>

<pallas_src>
import functools

import jax
import jax.numpy as jnp
from jax.experimental import pallas as pl
from jax.experimental.pallas import tpu as pltpu

EPS = 1e-5  # nn.LayerNorm default eps


def _round_up(x, m):
    return ((x + m - 1) // m) * m


def _vmem_budget_bytes():
    """Generation-aware (vmem_limit_bytes, per-step tile budget)."""
    try:
        cap = int(pltpu.get_tpu_info().vmem_capacity_bytes)  # 64 MiB v7x, 128 MiB v5e/v6e
    except Exception:
        cap = 64 * 1024 * 1024                               # conservative fallback
    limit = min(int(cap * 0.9), 100 * 1024 * 1024)
    budget = max(limit - 16 * 1024 * 1024, 12 * 1024 * 1024)  # headroom for compiler scratch
    return limit, budget


def _layernorm_rows_f32(x, d_valid):
    """LayerNorm over the lane axis of an f32 (bm, Dp) tile.

    Padded lanes are zero, so unmasked sums give the exact mean / E[x^2]
    (single-pass variance). Padded lanes of the result equal -mean*rsqrt(...),
    which is harmless because the padded K rows of the folded weight are zero.
    """
    inv_d = 1.0 / d_valid
    mean = jnp.sum(x, axis=-1, keepdims=True) * inv_d
    msq = jnp.sum(x * x, axis=-1, keepdims=True) * inv_d
    var = msq - mean * mean
    return (x - mean) * jax.lax.rsqrt(var + EPS)


def _resident_kernel(x_ref, w_ref, b_ref, o_ref, *, d_valid, compute_dtype):
    """Whole (gamma-folded) weight resident in VMEM; 1-D grid over row tiles."""
    xn = _layernorm_rows_f32(x_ref[...].astype(jnp.float32), d_valid)
    y = jnp.dot(xn.astype(compute_dtype), w_ref[...],
                preferred_element_type=jnp.float32)
    o_ref[...] = (y + b_ref[...].astype(jnp.float32)).astype(o_ref.dtype)


def _tiled_kernel(x_ref, w_ref, b_ref, o_ref, xn_ref, *, d_valid):
    """Column-tiled fallback: LN computed once per row tile, cached across j."""
    @pl.when(pl.program_id(1) == 0)
    def _():
        xn_ref[...] = _layernorm_rows_f32(
            x_ref[...].astype(jnp.float32), d_valid).astype(xn_ref.dtype)

    y = jnp.dot(xn_ref[...], w_ref[...], preferred_element_type=jnp.float32)
    o_ref[...] = (y + b_ref[...].astype(jnp.float32)).astype(o_ref.dtype)


def prepare_prenorm_linear_params(gamma, beta, w, bias,
                                  compute_dtype=jnp.float32):
    """Fold the LayerNorm affine into the Linear and pad to lane-dense tiles.

    (xn*g + b) @ W + c == xn @ (g[:,None]*W) + (b @ W + c).
    For static inference weights call this ONCE and reuse the result with
    prenorm_linear_prepared (avoids re-reading/re-writing W in HBM each step).
    """
    D, D_out = w.shape
    Dp, Dop = _round_up(D, 128), _round_up(D_out, 128)
    w32 = w.astype(jnp.float32)
    w_fold = (gamma.astype(jnp.float32)[:, None] * w32).astype(compute_dtype)
    b_fold = beta.astype(jnp.float32) @ w32 + bias.astype(jnp.float32)
    w_p = jnp.pad(w_fold, ((0, Dp - D), (0, Dop - D_out)))      # zero K/N pad
    b_p = jnp.pad(b_fold, (0, Dop - D_out)).reshape(1, Dop)     # f32 bias
    return w_p, b_p


@functools.partial(
    jax.jit,
    static_argnames=("d_valid", "d_out", "block_rows", "block_cols",
                     "compute_dtype", "force_column_tiling"))
def prenorm_linear_prepared(x, w_p, b_p, *, d_valid, d_out,
                            block_rows=512, block_cols=2048,
                            compute_dtype=jnp.float32,
                            force_column_tiling=False):
    """x: (B, S, D). w_p/b_p from prepare_prenorm_linear_params."""
    B, S, D = x.shape
    assert D == d_valid
    N = B * S
    Dp, Dop = w_p.shape
    sz_x = jnp.dtype(x.dtype).itemsize
    sz_c = jnp.dtype(compute_dtype).itemsize

    vmem_limit, budget = _vmem_budget_bytes()

    # ---- row tile ---------------------------------------------------------
    Nr = _round_up(N, 8)
    bm = min(block_rows, Nr)
    if pl.cdiv(N, bm) < 2 and Nr >= 16:
        # >= 2 row tiles keeps both TensorCores busy (v7x 2-TC / v6e megacore).
        bm = _round_up(pl.cdiv(Nr, 2), 8)

    def resident_bytes(bm_):
        # x/out double-buffered; W + bias resident for the whole call.
        # Budgeted at 2 buffers for W (we do not rely on pl.Buffered(1)).
        return (2 * bm_ * Dp * sz_x + 2 * Dp * Dop * sz_c
                + 2 * Dop * 4 + 2 * bm_ * Dop * sz_x)

    def tiled_bytes(bm_, bn_):
        return (2 * bm_ * Dp * sz_x + 2 * Dp * bn_ * sz_c + 2 * bn_ * 4
                + 2 * bm_ * bn_ * sz_x + bm_ * Dp * sz_c)   # + xn scratch

    use_resident = (not force_column_tiling) and resident_bytes(bm) <= budget

    if use_resident:
        kernel = functools.partial(_resident_kernel, d_valid=d_valid,
                                   compute_dtype=compute_dtype)
        grid = (pl.cdiv(N, bm),)
        in_specs = [
            pl.BlockSpec((bm, Dp), lambda i: (i, 0)),
            # Constant index_map: the folded weight is DMA'd from HBM once and
            # stays VMEM-resident across every row tile (no per-tile W
            # re-streaming -> MXU-bound).
            # TODO(synk): on builds where pipeline_mode=pl.Buffered(1) is
            # accepted, add it to this spec to halve the resident-W VMEM.
            pl.BlockSpec((Dp, Dop), lambda i: (0, 0)),
            pl.BlockSpec((1, Dop), lambda i: (0, 0)),
        ]
        out_specs = pl.BlockSpec((bm, Dop), lambda i: (i, 0))
        scratch_shapes = []
        dim_sem = ("parallel",)
    else:
        # Column-tiled fallback for weights too large to keep resident.
        # bn must divide Dop (no padded-column waste); shrink bm if needed.
        nlanes = Dop // 128
        max_k = max(1, min(nlanes, block_cols // 128))
        bn = None
        bm_try = bm
        while bn is None:
            for k in range(max_k, 0, -1):
                if nlanes % k == 0 and tiled_bytes(bm_try, k * 128) <= budget:
                    bn = k * 128
                    break
            if bn is None:
                if bm_try > 8:
                    bm_try = max(8, _round_up(bm_try // 2, 8))
                else:
                    bn = 128   # smallest legal tile; compiler has final say
        bm = bm_try
        kernel = functools.partial(_tiled_kernel, d_valid=d_valid)
        grid = (pl.cdiv(N, bm), Dop // bn)          # columns inner/sequential
        in_specs = [
            pl.BlockSpec((bm, Dp), lambda i, j: (i, 0)),
            pl.BlockSpec((Dp, bn), lambda i, j: (0, j)),
            pl.BlockSpec((1, bn), lambda i, j: (0, j)),
        ]
        out_specs = pl.BlockSpec((bm, bn), lambda i, j: (i, j))
        scratch_shapes = [pltpu.VMEM((bm, Dp), compute_dtype)]
        dim_sem = ("parallel", "arbitrary")   # xn scratch carried across j

    # Only the feature dim needs zero padding (for exact LN statistics); the
    # ragged last row tile is handled by Pallas (OOB rows dropped on write),
    # so there is no full-tensor row pad / slice pass over the activations.
    x2 = x.reshape(N, D)
    if Dp != D:
        x2 = jnp.pad(x2, ((0, 0), (0, Dp - D)))

    out = pl.pallas_call(
        kernel,
        out_shape=jax.ShapeDtypeStruct((N, Dop), x.dtype),
        grid_spec=pltpu.PrefetchScalarGridSpec(
            num_scalar_prefetch=0,
            grid=grid,
            in_specs=in_specs,
            out_specs=out_specs,
            scratch_shapes=scratch_shapes,
        ),
        compiler_params=pltpu.CompilerParams(
            dimension_semantics=dim_sem,
            vmem_limit_bytes=vmem_limit,
        ),
    )(x2, w_p, b_p)

    if Dop != d_out:
        out = out[:, :d_out]     # no-op (and no copy) when D_out % 128 == 0
    return out.reshape(B, S, d_out)


def prenorm_linear(x, gamma, beta, w, bias, *, block_rows=512, block_cols=2048,
                   compute_dtype=None, force_column_tiling=False):
    """PreNorm with fn = Linear:  Linear(LayerNorm(x)).  x: (B, S, D).

    compute_dtype: MXU matmul dtype. Defaults to bf16 for bf16 inputs and f32
    for f32 inputs; pass jnp.bfloat16 explicitly for f32 activations to get
    ~3-4x matmul throughput (LN statistics and accumulation stay in f32).
    """
    if compute_dtype is None:
        compute_dtype = jnp.bfloat16 if x.dtype == jnp.bfloat16 else jnp.float32
    w_p, b_p = prepare_prenorm_linear_params(gamma, beta, w, bias, compute_dtype)
    return prenorm_linear_prepared(
        x, w_p, b_p, d_valid=w.shape[0], d_out=w.shape[1],
        block_rows=block_rows, block_cols=block_cols,
        compute_dtype=compute_dtype, force_column_tiling=force_column_tiling)


def prenorm_linear_ref(x, gamma, beta, w, bias):
    xf = x.astype(jnp.float32)
    mean = jnp.mean(xf, axis=-1, keepdims=True)
    var = jnp.mean((xf - mean) ** 2, axis=-1, keepdims=True)
    xn = (xf - mean) / jnp.sqrt(var + EPS)
    xn = xn * gamma.astype(jnp.float32) + beta.astype(jnp.float32)
    return xn @ w.astype(jnp.float32) + bias.astype(jnp.float32)


if __name__ == "__main__":
    # TODO(synk): PreNorm wraps an arbitrary `fn`; here fn is a Linear layer
    # fused after the LayerNorm (the common transformer usage).
    key = jax.random.PRNGKey(0)

    # --- case 1: resident-W path ------------------------------------------
    B, S, D, D_out = 2, 8, 32, 32
    k1, k2, k3, k4, k5, key = jax.random.split(key, 6)
    x = jax.random.normal(k1, (B, S, D), dtype=jnp.float32)
    gamma = 1.0 + 0.1 * jax.random.normal(k2, (D,), dtype=jnp.float32)
    beta = 0.1 * jax.random.normal(k3, (D,), dtype=jnp.float32)
    w = 0.05 * jax.random.normal(k4, (D, D_out), dtype=jnp.float32)
    bias = 0.01 * jax.random.normal(k5, (D_out,), dtype=jnp.float32)

    y_ref = prenorm_linear_ref(x, gamma, beta, w, bias)

    # f32 path: full-precision matmul, tight tolerance.
    y = jax.block_until_ready(prenorm_linear(x, gamma, beta, w, bias))
    assert y.shape == (B, S, D_out) and y.dtype == x.dtype
    assert jnp.allclose(y.astype(jnp.float32), y_ref, atol=1e-4, rtol=1e-4), \
        "f32 resident path mismatch vs reference"

    # bf16 path: bf16 MXU matmul, f32 LN stats + accumulation.
    yb = jax.block_until_ready(
        prenorm_linear(x.astype(jnp.bfloat16), gamma, beta,
                       w.astype(jnp.bfloat16), bias.astype(jnp.bfloat16)))
    assert yb.dtype == jnp.bfloat16
    assert jnp.allclose(yb.astype(jnp.float32), y_ref, atol=5e-2, rtol=5e-2), \
        "bf16 resident path mismatch vs reference"

    # --- case 2: column-tiled path, ragged row tile, unaligned D -----------
    B2, S2, D2, D_out2 = 2, 9, 48, 384
    k1, k2, k3, k4, k5, key = jax.random.split(key, 6)
    x2 = jax.random.normal(k1, (B2, S2, D2), dtype=jnp.float32)
    gamma2 = 1.0 + 0.1 * jax.random.normal(k2, (D2,), dtype=jnp.float32)
    beta2 = 0.1 * jax.random.normal(k3, (D2,), dtype=jnp.float32)
    w2 = 0.05 * jax.random.normal(k4, (D2, D_out2), dtype=jnp.float32)
    bias2 = 0.01 * jax.random.normal(k5, (D_out2,), dtype=jnp.float32)

    y2 = jax.block_until_ready(
        prenorm_linear(x2, gamma2, beta2, w2, bias2,
                       block_cols=128, force_column_tiling=True))
    y2_ref = prenorm_linear_ref(x2, gamma2, beta2, w2, bias2)
    assert y2.shape == (B2, S2, D_out2)
    assert jnp.allclose(y2.astype(jnp.float32), y2_ref, atol=1e-4, rtol=1e-4), \
        "f32 column-tiled path mismatch vs reference"

    print("KERNEL_OK")
</pallas_src>

<mosaic_0001>
module attributes {stable_mosaic.version = 11 : i64} {
  func.func @_resident_kernel(%arg0: i32, %arg1: memref<8x128xf32, #tpu.memory_space<vmem>>, %arg2: memref<128x128xf32, #tpu.memory_space<vmem>>, %arg3: memref<1x128xf32, #tpu.memory_space<vmem>>, %arg4: memref<8x128xf32, #tpu.memory_space<vmem>>) attributes {dimension_semantics = [#tpu.dimension_semantics<parallel>], iteration_bounds = array<i64: 2>, scalar_prefetch = 0 : i64, scratch_operands = 0 : i64, tpu.core_type = #tpu.core_type<tc>, window_params = [{transform_indices = @transform_0, window_bounds = array<i64: 8, 128>}, {pipeline_mode = #tpu.pipeline_mode<synchronous>, transform_indices = @transform_1, window_bounds = array<i64: 128, 128>}, {pipeline_mode = #tpu.pipeline_mode<synchronous>, transform_indices = @transform_2, window_bounds = array<i64: 1, 128>}, {transform_indices = @transform_3, window_bounds = array<i64: 8, 128>}]} {
    %c0 = arith.constant 0 : index
    %c0_0 = arith.constant 0 : index
    %0 = vector.load %arg1[%c0, %c0_0] : memref<8x128xf32, #tpu.memory_space<vmem>>, vector<8x128xf32>
    %cst = arith.constant dense<0.000000e+00> : vector<8xf32>
    %1 = vector.multi_reduction <add>, %0, %cst [1] : vector<8x128xf32> to vector<8xf32>
    %2 = vector.shape_cast %1 : vector<8xf32> to vector<8x1xf32>
    %cst_1 = arith.constant 3.125000e-02 : f32
    %3 = vector.broadcast %cst_1 : f32 to vector<8x1xf32>
    %4 = arith.mulf %2, %3 : vector<8x1xf32>
    %5 = arith.mulf %0, %0 : vector<8x128xf32>
    %cst_2 = arith.constant dense<0.000000e+00> : vector<8xf32>
    %6 = vector.multi_reduction <add>, %5, %cst_2 [1] : vector<8x128xf32> to vector<8xf32>
    %7 = vector.shape_cast %6 : vector<8xf32> to vector<8x1xf32>
    %cst_3 = arith.constant 3.125000e-02 : f32
    %8 = vector.broadcast %cst_3 : f32 to vector<8x1xf32>
    %9 = arith.mulf %7, %8 : vector<8x1xf32>
    %10 = arith.mulf %4, %4 : vector<8x1xf32>
    %11 = arith.subf %9, %10 : vector<8x1xf32>
    %12 = vector.broadcast %4 : vector<8x1xf32> to vector<8x128xf32>
    %13 = arith.subf %0, %12 : vector<8x128xf32>
    %cst_4 = arith.constant 9.99999974E-6 : f32
    %14 = vector.broadcast %cst_4 : f32 to vector<8x1xf32>
    %15 = arith.addf %11, %14 : vector<8x1xf32>
    %16 = math.rsqrt %15 : vector<8x1xf32>
    %17 = vector.broadcast %16 : vector<8x1xf32> to vector<8x128xf32>
    %18 = arith.mulf %13, %17 : vector<8x128xf32>
    %c0_5 = arith.constant 0 : index
    %c0_6 = arith.constant 0 : index
    %19 = vector.load %arg2[%c0_5, %c0_6] : memref<128x128xf32, #tpu.memory_space<vmem>>, vector<128x128xf32>
    %cst_7 = arith.constant dense<0.000000e+00> : vector<8x128xf32>
    %20 = tpu.matmul %18, %19, %cst_7 {dimension_numbers = #tpu.dot_dimension_numbers<[1], [0], [0], [1], [0, 0, 1, 1], [], []>} : vector<8x128xf32>, vector<128x128xf32>, vector<8x128xf32> -> vector<8x128xf32>
    %c0_8 = arith.constant 0 : index
    %c0_9 = arith.constant 0 : index
    %21 = vector.load %arg3[%c0_8, %c0_9] : memref<1x128xf32, #tpu.memory_space<vmem>>, vector<1x128xf32>
    %22 = vector.broadcast %21 : vector<1x128xf32> to vector<8x128xf32>
    %23 = arith.addf %20, %22 : vector<8x128xf32>
    %c0_10 = arith.constant 0 : index
    %c0_11 = arith.constant 0 : index
    %24 = vector.load %arg4[%c0_10, %c0_11] : memref<8x128xf32, #tpu.memory_space<vmem>>, vector<8x128xf32>
    tpu.vector_store %arg4[%c0_10, %c0_11], %23 {strides = array<i32>} : memref<8x128xf32, #tpu.memory_space<vmem>>, vector<8x128xf32>,
    return
  }
  func.func @transform_0(%arg0: i32) -> (i32, i32) {
    %c0_i32 = arith.constant 0 : i32
    %c0_i32_0 = arith.constant 0 : i32
    return %arg0, %c0_i32 : i32, i32
  }
  func.func @transform_1(%arg0: i32) -> (i32, i32) {
    %c0_i32 = arith.constant 0 : i32
    %c0_i32_0 = arith.constant 0 : i32
    %c0_i32_1 = arith.constant 0 : i32
    return %c0_i32, %c0_i32_0 : i32, i32
  }
  func.func @transform_2(%arg0: i32) -> (i32, i32) {
    %c0_i32 = arith.constant 0 : i32
    %c0_i32_0 = arith.constant 0 : i32
    %c0_i32_1 = arith.constant 0 : i32
    return %c0_i32, %c0_i32_0 : i32, i32
  }
  func.func @transform_3(%arg0: i32) -> (i32, i32) {
    %c0_i32 = arith.constant 0 : i32
    %c0_i32_0 = arith.constant 0 : i32
    return %arg0, %c0_i32 : i32, i32
  }
}

</mosaic_0001>

<bundles_post_ra>
// kernel: prenorm_linear_prepared.1
= control target key start
LH: loop header
LB: loop body
LE: loop exit
PB: predicated region body
PF: predicated region fallthrough
CT: control target
= control target key end

     0   :  { %8 = vsyncpa [#allocation3], 0  ;;  %s412_s12 = smov 0   ;;  %s442_s0 = inlined_call_operand.vmem [shape: f32[16,128], index: 0, kind: input, shape index: {}]   ;;  %s443_s1 = inlined_call_operand.hbm [shape: f32[128,128], index: 1, kind: input, shape index: {}]   ;;  %s444_s2 = inlined_call_operand.vmem [shape: f32[1,128], index: 2, kind: input, shape index: {}]   ;;  %s445_s3 = inlined_call_operand.vmem [shape: f32[16,128], index: 3, kind: output, shape index: {}]  }
   0x1 LB: > { %s124_s15 = sshll.u32 %s443_s1, 4  ;;  %s312_s16 = sadd.s32 4294967295, %s387_s12   ;;  %s387_s12 = sphi %s412_s12, %s14_s12   ;;  %s125_s15 = int_to_ptr.hbm [resolvable:$true] %s124_s15 }
   0x2   : > { %p314_p0 = scmp.ge.s32.totalorder %s387_s12, 1  ;;  %p113_p1 = scmp.lt.s32.totalorder %s387_s12, 3 }
   0x3   : > { %p331_p2 = scmp.eq.s32.totalorder %s312_s16, 0  ;;  %s389_s17 = smov [#allocation2]  }
   0x4   : > { %p114_p3 = pnand %p314_p0, %p113_p1  ;;  %s126_s18 = sshll.u32 %s389_s17, 4  ;;  %s127_s18 = int_to_ptr.vmem [resolvable:$true] %s126_s18 }
   0x5   : > { %s390_s19 = smov 128   ;;  %s391_s20 = smov 8  }
   0x6   : > { %p327_p4 = pneg %p114_p3  ;;  %152 = sbr.rel (%p114_p3) target bundleno = 297 (0x129), region = 32 }
   0x8   : > { %p328_p5 = pnand %p331_p2, %p327_p4 }
   0xa   : > { %330 = dma.hbm_to_vmem [thread:$0]  (!%p328_p5), %s125_s15, 2048, %s127_s18, [#allocation3], %s390_s19, %s390_s19, %s391_s20  }
   0xb   : > { %382 = dma.done.wait (%p331_p2), [#allocation3], 2048  }
   0xc   : > { %384 = vsyncadd (%p331_p2), [#allocation3], 4294965248  ;;  %p175_p6 = scmp.lt.s32.totalorder %s312_s16, 1  ;;  %v221_v2 = vld [vmem:[#allocation2 + $0x78] sm:$0xff]  ;;  %v220_v3 = vld [vmem:[#allocation2 + $0x70] sm:$0xff] }
   0xd   : > { %226 = vmatpush.msra.mxu0 %v221_v2  ;;  %v219_v4 = vld [vmem:[#allocation2 + $0x68] sm:$0xff]  ;;  %v218_v5 = vld [vmem:[#allocation2 + $0x60] sm:$0xff]  ;;  %v217_v6 = vld [vmem:[#allocation2 + $0x58] sm:$0xff] }
   0xe   : > { %s447_s16 = smov (!%p175_p6, %s312_s16), 1  ;;  %v216_v7 = vld [vmem:[#allocation2 + $0x50] sm:$0xff]  ;;  %v215_v8 = vld [vmem:[#allocation2 + $0x48] sm:$0xff]  ;;  %v214_v9 = vld [vmem:[#allocation2 + $0x40] sm:$0xff] }
   0xf   : > { %s319_s21 = sshll.u32 %s447_s16, 3  ;;  %227 = vmatpush.msra.mxu0 %v220_v3  ;;  %v213_v10 = vld [vmem:[#allocation2 + $0x38] sm:$0xff]  ;;  %v212_v11 = vld [vmem:[#allocation2 + $0x30] sm:$0xff]  ;;  %v211_v12 = vld [vmem:[#allocation2 + $0x28] sm:$0xff] }
  0x10   : > { %s178_s24 = scalar_lea.vmem %s442_s0, %s319_s21  ;;  %v210_v13 = vld [vmem:[#allocation2 + $0x20] sm:$0xff]  ;;  %v209_v14 = vld [vmem:[#allocation2 + $0x18] sm:$0xff]  ;;  %v208_v15 = vld [vmem:[#allocation2 + $0x10] sm:$0xff]  ;;  %s182_s29 = scalar_lea.vmem %s445_s3, %s319_s21 }
  0x11   : > { %v183_v0 = vld [vmem:[%s178_s24] sm:$0xff]  ;;  %228 = vmatpush.msra.mxu0 %v219_v4  ;;  %v207_v16 = vld [vmem:[#allocation2 + $0x8] sm:$0xff] }
  0x12   : > { %184 = vadd.xlane.f32.xlu0 %v183_v0  ;;  %v187_v1 = vmul.f32 %v183_v0, %v183_v0  ;;  %v206_v17 = vld [vmem:[#allocation2] sm:$0xff] }
  0x13   : > { %229 = vmatpush.msra.mxu0 %v218_v5  ;;  %v344_v34 = vld [vmem:[%s444_s2] ss:$0 sm:$0xff] }
  0x15   : > { %230 = vmatpush.msra.mxu0 %v217_v6 }
  0x17   : > { %231 = vmatpush.msra.mxu0 %v216_v7 }
  0x19   : > { %232 = vmatpush.msra.mxu0 %v215_v8 }
  0x1a   : > { %188 = vadd.xlane.f32.xlu0 %v187_v1 }
  0x1b   : > { %233 = vmatpush.msra.mxu0 %v214_v9 }
  0x1d   : > { %234 = vmatpush.msra.mxu0 %v213_v10 }
  0x1f   : > { %235 = vmatpush.msra.mxu0 %v212_v11 }
  0x21   : > { %236 = vmatpush.msra.mxu0 %v211_v12 }
  0x23   : > { %237 = vmatpush.msra.mxu0 %v210_v13 }
  0x25   : > { %238 = vmatpush.msra.mxu0 %v209_v14 }
  0x27   : > { %239 = vmatpush.msra.mxu0 %v208_v15 }
  0x29   : > { %240 = vmatpush.msra.mxu0 %v207_v16 }
  0x2b   : > { %241 = vmatpush.msra.mxu0 %v206_v17 }
  0x85   : > { %v185_v18 = vpop.xlane.xlu0 %184 }
  0x86   : > { %v186_v19 = vmul.f32 0.03125, %v185_v18 }
  0x88   : > { %v191_v21 = vmul.f32 %v186_v19, %v186_v19  ;;  %v193_v31 = vsub.f32 %v183_v0, %v186_v19 }
  0x8d   : > { %v189_v20 = vpop.xlane.xlu0 %188 }
  0x8e   : > { %v190_v22 = vmul.f32 0.03125, %v189_v20 }
  0x90   : > { %v192_v23 = vsub.f32 %v190_v22, %v191_v21 }
  0x92   : > { %v194_v24 = vadd.f32 1e-05, %v192_v23 }
  0x94   : > { %345 = vrsqrt.f32 %v194_v24  ;;  %vm201_vm1 = vweird.f32 %v194_v24 }
  0x9a   : > { %v346_v25 = vpop.eup %345 }
  0x9b   : > { %v196_v26 = vmul.f32 %v346_v25, %v194_v24  ;;  %vm202_vm0 = vweird.f32 %v346_v25 }
  0x9c   : > { %vm203_vm2 = vmor %vm201_vm1, %vm202_vm0 }
  0x9d   : > { %v197_v27 = vmul.f32 %v346_v25, %v196_v26 }
  0x9f   : > { %v198_v28 = vmul.f32 0.5, %v197_v27 }
  0xa1   : > { %v199_v29 = vsub.f32 1.5, %v198_v28 }
  0xa3   : > { %v200_v30 = vmul.f32 %v346_v25, %v199_v29 }
  0xa5   : > { %v204_v32 = vsel %vm203_vm2, %v346_v25, %v200_v30 }
  0xa6   : > { %v205_v33 = vmul.f32 %v204_v32, %v193_v31 }
  0xa8   : > { %242 = vmatmul.f32.vlgmr.msra.gmra.mxu0 %v205_v33 }
 0x125   : > { %v243_v35 = vpop.f32.mrf.mxu0 }
 0x126   : > { %v244_v36 = vadd.f32 %v344_v34, %v243_v35 }
 0x128   : > { %246 = vst [vmem:[%s182_s29] sm:$0xff] %v244_v36 }
 0x129 PF: > { %s14_s12 = sadd.s32 1, %s387_s12  }
 0x12a   : > { %p11_p7 = scmp.ge.s32.totalorder %s14_s12, 4  }
 0x12c   :  { %13 = sbr.rel (!%p11_p7) target bundleno = 1 (0x1), region = 67 }
 0x131   :  { %266 = vsyncpa [#allocation3], 1 }
 0x132   :  { %268 = vsyncpa [#allocation3 + $0x1], 1 }

</bundles_post_ra>
